<compile_context>
chip_gen: v7x
topology: tpu7x:2x2x1
jax: 0.10.0
libtpu: 0.0.40
codegen_flags: <defaults>
</compile_context>

<pallas_src>
import jax
import jax.numpy as jnp
from jax.experimental import pallas as pl
from jax.experimental.pallas import tpu as pltpu


def _chamfer_kernel(gts_ref, preds_ref, out_ref):
    # gts_ref:   (Bt, N2, D)   -> x, point index on sublanes
    # preds_ref: (Bt, D, N1)   -> y, point index on lanes (lane-dense)
    # out_ref:   (Bt, 1, 128)  -> per-batch scalar broadcast across lanes
    x = gts_ref[...].astype(jnp.float32)     # [Bt, N2, D]
    y = preds_ref[...].astype(jnp.float32)   # [Bt, D, N1]

    d = x.shape[-1]

    # P[b, i, j] = ||x_bi - y_bj||^2 built from D broadcast (x_k - y_k)^2
    # terms: pure VPU work, no MXU push/pop, non-negative by construction.
    p = None
    for k in range(d):                                   # static unroll, D == 3
        diff = x[:, :, k:k + 1] - y[:, k:k + 1, :]       # [Bt, N2, N1]
        term = diff * diff
        p = term if p is None else p + term

    # torch.min(P, 1): min over gts points (sublane reduce), mean over preds.
    loss1 = jnp.mean(jnp.min(p, axis=1), axis=-1, keepdims=True)   # [Bt, 1]
    # torch.min(P, 2): min over preds points (lane reduce), mean over gts.
    loss2 = jnp.mean(jnp.min(p, axis=2), axis=-1, keepdims=True)   # [Bt, 1]
    val = (loss1 + loss2) * 0.5                                    # [Bt, 1]

    out_ref[...] = jnp.broadcast_to(val[:, :, None], out_ref.shape).astype(
        out_ref.dtype
    )


def _batch_block(b, n1, n2, d, cap=8, vmem_budget_bytes=8 << 20):
    """Largest divisor of b that is <= cap and keeps live VMEM per step small.

    Live f32 working set per batch element is roughly the pairwise matrix plus
    the two input tiles: (N2*N1 + N2*D + D*N1) * 4 bytes. Double-buffered
    inputs and the intermediate P are all covered comfortably by the budget.
    """
    per_batch = 4 * (n2 * n1 + n2 * d + d * n1)
    cap = max(1, min(cap, vmem_budget_bytes // max(per_batch, 1)))
    for bt in range(min(b, cap), 0, -1):
        if b % bt == 0:
            return bt
    return 1


def chamfer_distance(preds, gts):
    """preds: [B, N1, 3] (or [B, 3, N1]), gts: [B, N2, 3] -> [B] float32."""
    # Mirror the PyTorch module's shape fixup (static shape check; ambiguous
    # when N1 == 3 legitimately — exactly like the original module).
    if preds.shape[1] == 3:
        preds_t = preds                               # already [B, 3, N1]
        gts = gts[:, :, :3]
    else:
        preds_t = jnp.transpose(preds, (0, 2, 1))     # [B, 3, N1], lane-dense

    B, N2, D = gts.shape
    _, Dp, N1 = preds_t.shape
    assert D == Dp, (D, Dp)

    Bt = _batch_block(B, N1, N2, D)
    grid = (B // Bt,)

    out = pl.pallas_call(
        _chamfer_kernel,
        out_shape=jax.ShapeDtypeStruct((B, 1, 128), jnp.float32),
        grid_spec=pltpu.PrefetchScalarGridSpec(
            num_scalar_prefetch=0,
            grid=grid,
            in_specs=[
                pl.BlockSpec((Bt, N2, D), lambda b: (b, 0, 0)),    # gts  (x)
                pl.BlockSpec((Bt, D, N1), lambda b: (b, 0, 0)),    # preds^T (y)
            ],
            out_specs=pl.BlockSpec((Bt, 1, 128), lambda b: (b, 0, 0)),
        ),
        compiler_params=pltpu.CompilerParams(
            dimension_semantics=("parallel",),
        ),
    )(gts, preds_t)

    # Per-batch scalar lives at [:, 0, 0] of the lane-dense slab.
    return out[:, 0, 0]


def chamfer_reference(preds, gts):
    """Pure-JAX reference mirroring the PyTorch forward exactly."""
    if preds.shape[1] == 3:
        preds = jnp.transpose(preds, (0, 2, 1))
        gts = gts[:, :, :3]
    x, y = gts, preds
    xx = jnp.sum(x * x, axis=-1)                      # [B, N2]
    yy = jnp.sum(y * y, axis=-1)                      # [B, N1]
    zz = jnp.einsum("bik,bjk->bij", x, y)             # [B, N2, N1]
    P = xx[:, :, None] + yy[:, None, :] - 2.0 * zz
    loss1 = jnp.mean(jnp.min(P, axis=1), axis=1)
    loss2 = jnp.mean(jnp.min(P, axis=2), axis=1)
    return (loss1 + loss2) / 2.0


if __name__ == "__main__":
    key = jax.random.PRNGKey(0)
    kp, kg, kp2, kg2 = jax.random.split(key, 4)

    # Standard [B, N1, 3] layout.
    B, N1, N2 = 2, 64, 48
    preds = jax.random.normal(kp, (B, N1, 3), dtype=jnp.float32)
    gts = jax.random.normal(kg, (B, N2, 3), dtype=jnp.float32)

    out = chamfer_distance(preds, gts)
    jax.block_until_ready(out)
    ref = chamfer_reference(preds, gts)
    assert out.shape == (B,), out.shape
    assert jnp.allclose(out, ref, atol=1e-4, rtol=1e-4), (out, ref)

    # Larger batch exercises the batch-blocked grid path.
    B2, N1b, N2b = 4, 96, 80
    preds2 = jax.random.normal(kp2, (B2, N1b, 3), dtype=jnp.float32)
    gts2 = jax.random.normal(kg2, (B2, N2b, 3), dtype=jnp.float32)
    out2 = chamfer_distance(preds2, gts2)
    jax.block_until_ready(out2)
    ref2 = chamfer_reference(preds2, gts2)
    assert out2.shape == (B2,), out2.shape
    assert jnp.allclose(out2, ref2, atol=1e-4, rtol=1e-4), (out2, ref2)

    print("KERNEL_OK")
</pallas_src>

<mosaic_0001>
module attributes {stable_mosaic.version = 11 : i64} {
  func.func @_chamfer_kernel(%arg0: i32, %arg1: memref<2x48x3xf32, #tpu.memory_space<vmem>>, %arg2: memref<2x3x64xf32, #tpu.memory_space<vmem>>, %arg3: memref<2x1x128xf32, #tpu.memory_space<vmem>>) attributes {dimension_semantics = [#tpu.dimension_semantics<parallel>], iteration_bounds = array<i64: 1>, scalar_prefetch = 0 : i64, scratch_operands = 0 : i64, tpu.core_type = #tpu.core_type<tc>, window_params = [{transform_indices = @transform_0, window_bounds = array<i64: 2, 48, 3>}, {transform_indices = @transform_1, window_bounds = array<i64: 2, 3, 64>}, {transform_indices = @transform_2, window_bounds = array<i64: 2, 1, 128>}]} {
    %c0 = arith.constant 0 : index
    %c0_0 = arith.constant 0 : index
    %c0_1 = arith.constant 0 : index
    %0 = vector.load %arg1[%c0, %c0_0, %c0_1] : memref<2x48x3xf32, #tpu.memory_space<vmem>>, vector<2x48x3xf32>
    %c0_2 = arith.constant 0 : index
    %c0_3 = arith.constant 0 : index
    %c0_4 = arith.constant 0 : index
    %1 = vector.load %arg2[%c0_2, %c0_3, %c0_4] : memref<2x3x64xf32, #tpu.memory_space<vmem>>, vector<2x3x64xf32>
    %2 = vector.extract_strided_slice %0 {offsets = [0, 0, 0], sizes = [2, 48, 1], strides = [1, 1, 1]} : vector<2x48x3xf32> to vector<2x48x1xf32>
    %3 = vector.extract_strided_slice %1 {offsets = [0, 0, 0], sizes = [2, 1, 64], strides = [1, 1, 1]} : vector<2x3x64xf32> to vector<2x1x64xf32>
    %4 = vector.broadcast %2 : vector<2x48x1xf32> to vector<2x48x64xf32>
    %5 = vector.broadcast %3 : vector<2x1x64xf32> to vector<2x48x64xf32>
    %6 = arith.subf %4, %5 : vector<2x48x64xf32>
    %7 = arith.mulf %6, %6 : vector<2x48x64xf32>
    %8 = vector.extract_strided_slice %0 {offsets = [0, 0, 1], sizes = [2, 48, 1], strides = [1, 1, 1]} : vector<2x48x3xf32> to vector<2x48x1xf32>
    %9 = vector.extract_strided_slice %1 {offsets = [0, 1, 0], sizes = [2, 1, 64], strides = [1, 1, 1]} : vector<2x3x64xf32> to vector<2x1x64xf32>
    %10 = vector.broadcast %8 : vector<2x48x1xf32> to vector<2x48x64xf32>
    %11 = vector.broadcast %9 : vector<2x1x64xf32> to vector<2x48x64xf32>
    %12 = arith.subf %10, %11 : vector<2x48x64xf32>
    %13 = arith.mulf %12, %12 : vector<2x48x64xf32>
    %14 = arith.addf %7, %13 : vector<2x48x64xf32>
    %15 = vector.extract_strided_slice %0 {offsets = [0, 0, 2], sizes = [2, 48, 1], strides = [1, 1, 1]} : vector<2x48x3xf32> to vector<2x48x1xf32>
    %16 = vector.extract_strided_slice %1 {offsets = [0, 2, 0], sizes = [2, 1, 64], strides = [1, 1, 1]} : vector<2x3x64xf32> to vector<2x1x64xf32>
    %17 = vector.broadcast %15 : vector<2x48x1xf32> to vector<2x48x64xf32>
    %18 = vector.broadcast %16 : vector<2x1x64xf32> to vector<2x48x64xf32>
    %19 = arith.subf %17, %18 : vector<2x48x64xf32>
    %20 = arith.mulf %19, %19 : vector<2x48x64xf32>
    %21 = arith.addf %14, %20 : vector<2x48x64xf32>
    %cst = arith.constant dense<0x7F800000> : vector<2x64xf32>
    %22 = vector.multi_reduction <minimumf>, %21, %cst [1] : vector<2x48x64xf32> to vector<2x64xf32>
    %cst_5 = arith.constant dense<0.000000e+00> : vector<2xf32>
    %23 = vector.multi_reduction <add>, %22, %cst_5 [1] : vector<2x64xf32> to vector<2xf32>
    %24 = vector.shape_cast %23 : vector<2xf32> to vector<2x1xf32>
    %cst_6 = arith.constant 6.400000e+01 : f32
    %25 = vector.broadcast %cst_6 : f32 to vector<2x1xf32>
    %26 = arith.divf %24, %25 : vector<2x1xf32>
    %cst_7 = arith.constant dense<0x7F800000> : vector<2x48xf32>
    %27 = vector.multi_reduction <minimumf>, %21, %cst_7 [2] : vector<2x48x64xf32> to vector<2x48xf32>
    %cst_8 = arith.constant dense<0.000000e+00> : vector<2xf32>
    %28 = vector.multi_reduction <add>, %27, %cst_8 [1] : vector<2x48xf32> to vector<2xf32>
    %29 = vector.shape_cast %28 : vector<2xf32> to vector<2x1xf32>
    %cst_9 = arith.constant 4.800000e+01 : f32
    %30 = vector.broadcast %cst_9 : f32 to vector<2x1xf32>
    %31 = arith.divf %29, %30 : vector<2x1xf32>
    %32 = arith.addf %26, %31 : vector<2x1xf32>
    %cst_10 = arith.constant 5.000000e-01 : f32
    %33 = vector.broadcast %cst_10 : f32 to vector<2x1xf32>
    %34 = arith.mulf %32, %33 : vector<2x1xf32>
    %35 = vector.shape_cast %34 : vector<2x1xf32> to vector<2x1x1xf32>
    %36 = vector.shape_cast %35 : vector<2x1x1xf32> to vector<2x1x1xf32>
    %37 = vector.broadcast %36 : vector<2x1x1xf32> to vector<2x1x128xf32>
    %c0_11 = arith.constant 0 : index
    %c0_12 = arith.constant 0 : index
    %c0_13 = arith.constant 0 : index
    %38 = vector.load %arg3[%c0_11, %c0_12, %c0_13] : memref<2x1x128xf32, #tpu.memory_space<vmem>>, vector<2x1x128xf32>
    tpu.vector_store %arg3[%c0_11, %c0_12, %c0_13], %37 {strides = array<i32>} : memref<2x1x128xf32, #tpu.memory_space<vmem>>, vector<2x1x128xf32>,
    return
  }
  func.func @transform_0(%arg0: i32) -> (i32, i32, i32) {
    %c0_i32 = arith.constant 0 : i32
    %c0_i32_0 = arith.constant 0 : i32
    %c0_i32_1 = arith.constant 0 : i32
    return %arg0, %c0_i32, %c0_i32_0 : i32, i32, i32
  }
  func.func @transform_1(%arg0: i32) -> (i32, i32, i32) {
    %c0_i32 = arith.constant 0 : i32
    %c0_i32_0 = arith.constant 0 : i32
    %c0_i32_1 = arith.constant 0 : i32
    return %arg0, %c0_i32, %c0_i32_0 : i32, i32, i32
  }
  func.func @transform_2(%arg0: i32) -> (i32, i32, i32) {
    %c0_i32 = arith.constant 0 : i32
    %c0_i32_0 = arith.constant 0 : i32
    %c0_i32_1 = arith.constant 0 : i32
    return %arg0, %c0_i32, %c0_i32_0 : i32, i32, i32
  }
}

</mosaic_0001>

<bundles_post_ra>
// kernel: tpu_custom_call.1
= control target key start
LH: loop header
LB: loop body
LE: loop exit
PB: predicated region body
PF: predicated region fallthrough
CT: control target
= control target key end

     0   :  { %v539_v2 = vmov 0   ;;  %s759_s0 = inlined_call_operand.vmem [shape: f32[2,48,3], index: 0, kind: input, shape index: {}]   ;;  %s760_s1 = inlined_call_operand.vmem [shape: f32[2,3,64], index: 1, kind: input, shape index: {}]   ;;  %s761_s2 = inlined_call_operand.hbm [shape: f32[2,1,128], index: 2, kind: output, shape index: {}]  }
   0x1   :  { %v18_v0 = vld [vmem:[%s759_s0 + $0x30] sm:$0xff]  ;;  %v12_v1 = vld [vmem:[%s759_s0] sm:$0xff]  ;;  %500 = vset.pattern.permute.xlu1 %v539_v2  ;;  %499 = vset.pattern.permute.xlu0 %v539_v2  ;;  %v19_v3 = vld [vmem:[%s759_s0 + $0x38] sm:$0xff] }
   0x2   :  { %58 = vperm.xlu1 %500, %v18_v0   ;;  %28 = vperm.xlu0 %499, %v12_v1   ;;  %v13_v4 = vld [vmem:[%s759_s0 + $0x8] sm:$0xff] }
   0x3   :  { %7 = vsyncpa [#allocation3], 0  ;;  %v20_v5 = vld [vmem:[%s759_s0 + $0x40] sm:$0xff]  ;;  %v540_v6 = vmov 1   ;;  %v15_v7 = vld [vmem:[%s759_s0 + $0x18] sm:$0xff]  ;;  %v541_v14 = vmov 2   ;;  %v86_v27 = vlaneseq }
   0x4   :  { %v16_v8 = vld [vmem:[%s759_s0 + $0x20] sm:$0xff]  ;;  %v14_v9 = vld [vmem:[%s759_s0 + $0x10] sm:$0xff]  ;;  %v17_v10 = vld [vmem:[%s759_s0 + $0x28] sm:$0xff]  ;;  %vm302_vm0 = vcmask 523264   ;;  %vm339_vm1 = vcmask 1041409   ;;  %vm342_vm2 = vcmask 517120  }
   0x5   :  { %v21_v11 = vld [vmem:[%s759_s0 + $0x48] sm:$0xff]  ;;  %v22_v12 = vld [vmem:[%s759_s0 + $0x50] sm:$0xff]  ;;  %v23_v13 = vld [vmem:[%s759_s0 + $0x58] sm:$0xff]  ;;  %v611_v30 = vshrl.u32 %v86_v27, 7  ;;  %vm395_vm3 = vcmask 130112   ;;  %vm402_vm4 = vcmask 195712  }
   0x6   :  { %63 = vperm.xlu1 %500, %v19_v3   ;;  %33 = vperm.xlu0 %499, %v13_v4   ;;  %v24_v33 = vld [vmem:[%s760_s1] sm:$0x7]  ;;  %v25_v40 = vld [vmem:[%s760_s1 + $0x4] sm:$0x7]  ;;  %vm409_vm5 = vcmask 261312   ;;  %vm416_vm6 = vcmask 326912  }
   0x7   :  { %v614_v32 = vsub.s32 1, %v611_v30  ;;  %v622_v35 = vsub.s32 0, %v611_v30  ;;  %v260_v39 = vsub.s32 2, %v611_v30  ;;  %vm423_vm7 = vcmask 392512   ;;  %s542_s1 = smov [#allocation2]  }
   0x8   :  { %vm456_vm8 = vcmask 386048   ;;  %s482_s8 = sshll.u32 %s542_s1, 4  ;;  %s483_s8 = int_to_ptr.vmem [resolvable:$true] %s482_s8 }
   0x9   :  { %v627_v37 = vrot.slane %v24_v33, %v622_v35  ;;  %v630_v38 = vrot.slane %v24_v33, %v614_v32  ;;  %v643_v45 = vrot.slane %v25_v40, %v614_v32  ;;  %v645_v46 = vrot.slane %v24_v33, %v260_v39  ;;  %s515_s9 = scalar_lea.vmem %s483_s8, 32  ;;  %p520_p1 = scmp.lt.s32.totalorder %s483_s8, %s483_s8 }
   0xa   :  { %501 = vset.pattern.permute.xlu1 %v540_v6  ;;  %68 = vperm.xlu0 %499, %v20_v5   ;;  %v648_v47 = vrot.slane %v25_v40, %v622_v35  ;;  %v656_v56 = vrot.slane %v25_v40, %v260_v39  ;;  %p516_p0 = scmp.ne.s32.totalorder %s483_s8, %s515_s9  ;;  %p521_p2 = scmp.lt.s32.totalorder %s515_s9, %s515_s9 }
   0xb   :  { %123 = vperm.xlu1 %501, %v13_v4  }
   0xc   :  { %p522_p3 = por %p521_p2, %p520_p1 }
   0xe   :  { %43 = vperm.xlu0 %499, %v15_v7   ;;  %p523_p4 = pnand %p522_p3, %p516_p0 }
   0xf   :  { %143 = vperm.xlu1 %501, %v18_v0  }
  0x12   :  { %48 = vperm.xlu0 %499, %v16_v8  }
  0x13   :  { %502 = vset.pattern.permute.xlu1 %v539_v2 }
  0x14   :  { %38 = vperm.xlu1 %502, %v14_v9  }
  0x16   :  { %53 = vperm.xlu0 %499, %v17_v10  }
  0x18   :  { %503 = vset.pattern.permute.xlu1 %v540_v6 }
  0x19   :  { %127 = vperm.xlu1 %503, %v14_v9  }
  0x1a   :  { %510 = vset.pattern.permute.xlu0 %v540_v6 }
  0x1b   :  { %119 = vperm.xlu0 %510, %v12_v1  }
  0x1d   :  { %151 = vperm.xlu1 %503, %v20_v5  }
  0x1f   :  { %147 = vperm.xlu0 %510, %v19_v3  }
  0x21   :  { %504 = vset.pattern.permute.xlu1 %v539_v2 }
  0x22   :  { %73 = vperm.xlu1 %504, %v21_v11  }
  0x23   :  { %131 = vperm.xlu0 %510, %v15_v7  }
  0x26   :  { %505 = vset.pattern.permute.xlu1 %v540_v6 }
  0x27   :  { %155 = vperm.xlu1 %505, %v21_v11   ;;  %159 = vperm.xlu0 %510, %v22_v12  }
  0x2b   :  { %506 = vset.pattern.permute.xlu1 %v541_v14  ;;  %163 = vperm.xlu0 %510, %v23_v13  }
  0x2c   :  { %211 = vperm.xlu1 %506, %v12_v1  }
  0x2f   :  { %513 = vset.pattern.permute.xlu0 %v541_v14 }
  0x30   :  { %235 = vperm.xlu1 %506, %v18_v0   ;;  %215 = vperm.xlu0 %513, %v13_v4  }
  0x34   :  { %239 = vperm.xlu1 %506, %v19_v3   ;;  %227 = vperm.xlu0 %513, %v16_v8  }
  0x38   :  { %507 = vset.pattern.permute.xlu1 %v539_v2  ;;  %255 = vperm.xlu0 %513, %v23_v13  }
  0x39   :  { %78 = vperm.xlu1 %507, %v22_v12  }
  0x3d   :  { %508 = vset.pattern.permute.xlu1 %v540_v6 }
  0x3e   :  { %135 = vperm.xlu1 %508, %v16_v8  }
  0x42   :  { %509 = vset.pattern.permute.xlu1 %v541_v14 }
  0x43   :  { %219 = vperm.xlu1 %509, %v14_v9  }
  0x47   :  { %243 = vperm.xlu1 %509, %v20_v5  }
  0x4b   :  { %511 = vset.pattern.permute.xlu1 %v539_v2 }
  0x4c   :  { %83 = vperm.xlu1 %511, %v23_v13  }
  0x50   :  { %512 = vset.pattern.permute.xlu1 %v540_v6 }
  0x51   :  { %139 = vperm.xlu1 %512, %v17_v10  }
  0x55   :  { %514 = vset.pattern.permute.xlu1 %v541_v14 }
  0x56   :  { %223 = vperm.xlu1 %514, %v15_v7  }
  0x5a   :  { %247 = vperm.xlu1 %514, %v21_v11  }
  0x5e   :  { %251 = vperm.xlu1 %514, %v22_v12  }
  0x62   :  { %231 = vperm.xlu1 %514, %v17_v10  }
  0x81   :  { %v59_v15 = vpop.permute.xlu1 %58  ;;  %v29_v16 = vpop.permute.xlu0 %28 }
  0x82   :  { %v94_v41 = vsub.f32 %v29_v16, %v627_v37  ;;  %v100_v57 = vsub.f32 %v59_v15, %v648_v47 }
  0x84   :  { %v106_v50 = vmul.f32 %v94_v41, %v94_v41  ;;  %v112_v6 = vmul.f32 %v100_v57, %v100_v57 }
  0x85   :  { %v64_v17 = vpop.permute.xlu1 %63  ;;  %v34_v18 = vpop.permute.xlu0 %33 }
  0x86   :  { %v95_v48 = vsub.f32 %v34_v18, %v627_v37  ;;  %v101_v63 = vsub.f32 %v64_v17, %v648_v47 }
  0x88   :  { %v107_v58 = vmul.f32 %v95_v48, %v95_v48  ;;  %v113_v13 = vmul.f32 %v101_v63, %v101_v63 }
  0x89   :  { %v596_v19 = vpop.permute.xlu0 %68 }
  0x8a   :  { %v124_v20 = vpop.permute.xlu1 %123  ;;  %v102_v48 = vsub.f32 %v596_v19, %v648_v47 }
  0x8b   :  { %v175_v49 = vsub.f32 %v124_v20, %v630_v38 }
  0x8d   :  { %v598_v21 = vpop.permute.xlu0 %43  ;;  %v187_v59 = vmul.f32 %v175_v49, %v175_v49 }
  0x8e   :  { %v144_v22 = vpop.permute.xlu1 %143 }
  0x8f   :  { %v180_v54 = vsub.f32 %v144_v22, %v643_v45  ;;  %v199_v7 = vadd.f32 %v187_v59, %v107_v58 }
  0x91   :  { %v600_v23 = vpop.permute.xlu0 %48  ;;  %v192_v2 = vmul.f32 %v180_v54, %v180_v54 }
  0x93   :  { %v602_v24 = vpop.permute.xlu1 %38  ;;  %v204_v14 = vadd.f32 %v192_v2, %v112_v6  ;;  %v98_v6 = vsub.f32 %v600_v23, %v627_v37 }
  0x95   :  { %v604_v25 = vpop.permute.xlu0 %53 }
  0x98   :  { %v606_v26 = vpop.permute.xlu1 %127 }
  0x99   :  { %v176_v40 = vsub.f32 %v606_v26, %v630_v38 }
  0x9a   :  { %v120_v28 = vpop.permute.xlu0 %119 }
  0x9b   :  { %v174_v42 = vsub.f32 %v120_v28, %v630_v38  ;;  %v188_v49 = vmul.f32 %v176_v40, %v176_v40 }
  0x9c   :  { %v608_v29 = vpop.permute.xlu1 %151 }
  0x9d   :  { %v186_v51 = vmul.f32 %v174_v42, %v174_v42  ;;  %v96_v42 = vsub.f32 %v602_v24, %v627_v37 }
  0x9e   :  { %v148_v31 = vpop.permute.xlu0 %147 }
  0x9f   :  { %v198_v60 = vadd.f32 %v186_v51, %v106_v50  ;;  %v181_v61 = vsub.f32 %v148_v31, %v643_v45  ;;  %v182_v50 = vsub.f32 %v608_v29, %v643_v45 }
  0xa1   :  { %v619_v34 = vpop.permute.xlu1 %73  ;;  %v193_v8 = vmul.f32 %v181_v61, %v181_v61  ;;  %v194_v58 = vmul.f32 %v182_v50, %v182_v50 }
  0xa2   :  { %v624_v36 = vpop.permute.xlu0 %131 }
  0xa3   :  { %v205_v17 = vadd.f32 %v193_v8, %v113_v13  ;;  %v177_v2 = vsub.f32 %v624_v36, %v630_v38  ;;  %v110_v36 = vmul.f32 %v98_v6, %v98_v6 }
  0xa6   :  { %v638_v43 = vpop.permute.xlu1 %155  ;;  %v640_v44 = vpop.permute.xlu0 %159 }
  0xa7   :  { %v184_v23 = vsub.f32 %v640_v44, %v643_v45 }
  0xa9   :  { %v196_v50 = vmul.f32 %v184_v23, %v184_v23 }
  0xaa   :  { %v652_v52 = vpop.permute.xlu0 %163 }
  0xab   :  { %v212_v53 = vpop.permute.xlu1 %211 }
  0xac   :  { %v266_v55 = vsub.f32 %v212_v53, %v645_v46  ;;  %v108_v53 = vmul.f32 %v96_v42, %v96_v42 }
  0xae   :  { %v278_v62 = vmul.f32 %v266_v55, %v266_v55  ;;  %v114_v55 = vmul.f32 %v102_v48, %v102_v48  ;;  %v200_v57 = vadd.f32 %v188_v49, %v108_v53 }
  0xaf   :  { %v236_v0 = vpop.permute.xlu1 %235  ;;  %v216_v1 = vpop.permute.xlu0 %215 }
  0xb0   :  { %v272_v3 = vsub.f32 %v236_v0, %v656_v56  ;;  %v267_v4 = vsub.f32 %v216_v1, %v645_v46  ;;  %v290_v5 = vadd.f32 %v278_v62, %v198_v60  ;;  %v206_v24 = vadd.f32 %v194_v58, %v114_v55 }
  0xb2   :  { %v284_v9 = vmul.f32 %v272_v3, %v272_v3  ;;  %v279_v10 = vmul.f32 %v267_v4, %v267_v4  ;;  %v664_v11 = vsel %vm302_vm0, %v290_v5, inf  ;;  %v97_v5 = vsub.f32 %v598_v21, %v627_v37 }
  0xb3   :  { %v240_v12 = vpop.permute.xlu1 %239  ;;  %348 = vmin.xlane.f32.xlu1 %v664_v11  ;;  %v228_v3 = vpop.permute.xlu0 %227 }
  0xb4   :  { %v273_v15 = vsub.f32 %v240_v12, %v656_v56  ;;  %v291_v16 = vadd.f32 %v279_v10, %v199_v7  ;;  %v296_v22 = vadd.f32 %v284_v9, %v204_v14  ;;  %v183_v7 = vsub.f32 %v638_v43, %v643_v45 }
  0xb5   :  { %v270_v9 = vsub.f32 %v228_v3, %v645_v46  ;;  %v189_v10 = vmul.f32 %v177_v2, %v177_v2  ;;  %v109_v14 = vmul.f32 %v97_v5, %v97_v5  ;;  %v185_v43 = vsub.f32 %v652_v52, %v643_v45 }
  0xb6   :  { %v285_v18 = vmul.f32 %v273_v15, %v273_v15  ;;  %v669_v20 = vsel %vm302_vm0, %v291_v16, inf  ;;  %v676_v39 = vsel %vm302_vm0, %v296_v22, inf  ;;  %v103_v15 = vsub.f32 %v619_v34, %v648_v47 }
  0xb7   :  { %350 = vmin.xlane.f32.xlu0 %v669_v20  ;;  %v256_v13 = vpop.permute.xlu0 %255  ;;  %v195_v21 = vmul.f32 %v183_v7, %v183_v7 }
  0xb8   :  { %v79_v28 = vpop.permute.xlu1 %78  ;;  %v297_v31 = vadd.f32 %v285_v18, %v205_v17  ;;  %v277_v40 = vsub.f32 %v256_v13, %v656_v56  ;;  %v115_v34 = vmul.f32 %v103_v15, %v103_v15 }
  0xb9   :  { %v104_v18 = vsub.f32 %v79_v28, %v648_v47 }
  0xba   :  { %v673_v33 = vsel %vm302_vm0, %v297_v31, inf  ;;  %v282_v31 = vmul.f32 %v270_v9, %v270_v9  ;;  %v289_v52 = vmul.f32 %v277_v40, %v277_v40 }
  0xbb   :  { %362 = vmin.xlane.f32.xlu1 %v673_v33  ;;  %360 = vmin.xlane.f32.xlu0 %v676_v39  ;;  %v116_v45 = vmul.f32 %v104_v18, %v104_v18 }
  0xbd   :  { %v136_v41 = vpop.permute.xlu1 %135 }
  0xbe   :  { %v178_v1 = vsub.f32 %v136_v41, %v630_v38  ;;  %v201_v41 = vadd.f32 %v189_v10, %v109_v14 }
  0xc0   :  { %v190_v8 = vmul.f32 %v178_v1, %v178_v1 }
  0xc2   :  { %v220_v51 = vpop.permute.xlu1 %219  ;;  %v202_v22 = vadd.f32 %v190_v8, %v110_v36 }
  0xc3   :  { %v268_v54 = vsub.f32 %v220_v51, %v645_v46  ;;  %v197_v51 = vmul.f32 %v185_v43, %v185_v43 }
  0xc4   :  { %v294_v55 = vadd.f32 %v282_v31, %v202_v22 }
  0xc5   :  { %v280_v59 = vmul.f32 %v268_v54, %v268_v54  ;;  %v207_v54 = vadd.f32 %v195_v21, %v115_v34 }
  0xc6   :  { %v244_v26 = vpop.permute.xlu1 %243 }
  0xc7   :  { %v274_v60 = vsub.f32 %v244_v26, %v656_v56  ;;  %v292_v61 = vadd.f32 %v280_v59, %v200_v57  ;;  %v99_v26 = vsub.f32 %v604_v25, %v627_v37 }
  0xc9   :  { %v286_v62 = vmul.f32 %v274_v60, %v274_v60  ;;  %v691_v19 = vsel %vm302_vm0, %v292_v61, inf }
  0xca   :  { %352 = vmin.xlane.f32.xlu0 %v691_v19  ;;  %v306_v9 = vmin.f32 %v664_v11, %v691_v19 }
  0xcb   :  { %v84_v29 = vpop.permute.xlu1 %83  ;;  %v298_v63 = vadd.f32 %v286_v62, %v206_v24  ;;  %v208_v24 = vadd.f32 %v196_v50, %v116_v45  ;;  %v309_v62 = vsel %vm302_vm0, %v294_v55, inf  ;;  %v385_v50 = vand.u32 127, %v86_v27 }
  0xcc   :  { %v105_v12 = vsub.f32 %v84_v29, %v648_v47  ;;  %v310_v36 = vmin.f32 %v306_v9, %v309_v62 }
  0xcd   :  { %v695_v0 = vsel %vm302_vm0, %v298_v63, inf  ;;  %v404_v45 = vadd.s32 4294967272, %v385_v50  ;;  %v411_v55 = vadd.s32 4294967264, %v385_v50 }
  0xce   :  { %364 = vmin.xlane.f32.xlu1 %v695_v0  ;;  %v117_v42 = vmul.f32 %v105_v12, %v105_v12  ;;  %v323_v37 = vmin.f32 %v676_v39, %v695_v0 }
  0xd0   :  { %v140_v4 = vpop.permute.xlu1 %139  ;;  %v209_v57 = vadd.f32 %v197_v51, %v117_v42 }
  0xd1   :  { %v179_v47 = vsub.f32 %v140_v4, %v630_v38  ;;  %v111_v4 = vmul.f32 %v99_v26, %v99_v26  ;;  %v418_v26 = vadd.s32 4294967256, %v385_v50 }
  0xd2   :  { %v301_v2 = vadd.f32 %v289_v52, %v209_v57 }
  0xd3   :  { %v191_v29 = vmul.f32 %v179_v47, %v179_v47 }
  0xd4   :  { %v328_v8 = vsel %vm302_vm0, %v301_v2, inf }
  0xd5   :  { %v224_v16 = vpop.permute.xlu1 %223 }
  0xd6   :  { %v269_v17 = vsub.f32 %v224_v16, %v645_v46 }
  0xd8   :  { %v281_v48 = vmul.f32 %v269_v17, %v269_v17 }
  0xd9   :  { %v248_v49 = vpop.permute.xlu1 %247 }
  0xda   :  { %v275_v44 = vsub.f32 %v248_v49, %v656_v56  ;;  %v293_v53 = vadd.f32 %v281_v48, %v201_v41 }
  0xdc   :  { %v287_v28 = vmul.f32 %v275_v44, %v275_v44  ;;  %v307_v58 = vsel %vm302_vm0, %v293_v53, inf  ;;  %v390_v44 = vadd.s32 4294967288, %v385_v50  ;;  %v397_v53 = vadd.s32 4294967280, %v385_v50 }
  0xdd   :  { %v252_v59 = vpop.permute.xlu1 %251  ;;  %354 = vmin.xlane.f32.xlu0 %v307_v58  ;;  %v308_v13 = vmin.f32 %v669_v20, %v307_v58  ;;  %v388_v58 = vsub.s32 %v385_v50, %v611_v30 }
  0xde   :  { %v276_v60 = vsub.f32 %v252_v59, %v656_v56  ;;  %v299_v61 = vadd.f32 %v287_v28, %v207_v54  ;;  %v203_v56 = vadd.f32 %v191_v29, %v111_v4  ;;  %v393_v57 = vsub.s32 %v390_v44, %v611_v30 }
  0xdf   :  { %v400_v47 = vsub.s32 %v397_v53, %v611_v30  ;;  %v407_v59 = vsub.s32 %v404_v45, %v611_v30  ;;  %v421_v4 = vsub.s32 %v418_v26, %v611_v30 }
  0xe0   :  { %v288_v63 = vmul.f32 %v276_v60, %v276_v60  ;;  %v324_v1 = vsel %vm302_vm0, %v299_v61, inf  ;;  %v414_v60 = vsub.s32 %v411_v55, %v611_v30 }
  0xe1   :  { %v232_v38 = vpop.permute.xlu1 %231  ;;  %366 = vmin.xlane.f32.xlu1 %v324_v1  ;;  %v325_v3 = vmin.f32 %v673_v33, %v324_v1  ;;  %356 = vmin.xlane.f32.xlu0 %v309_v62 }
  0xe2   :  { %v271_v5 = vsub.f32 %v232_v38, %v645_v46  ;;  %v300_v25 = vadd.f32 %v288_v63, %v208_v24 }
  0xe3   :  { %v329_v33 = vmin.f32 %v325_v3, %v328_v8 }
  0xe4   :  { %v283_v6 = vmul.f32 %v271_v5, %v271_v5  ;;  %v326_v7 = vsel %vm302_vm0, %v300_v25, inf }
  0xe5   :  { %368 = vmin.xlane.f32.xlu1 %v326_v7  ;;  %v327_v10 = vmin.f32 %v323_v37, %v326_v7 }
  0xe6   :  { %v295_v12 = vadd.f32 %v283_v6, %v203_v56 }
  0xe7   :  { %v330_v46 = vmin.f32 %v327_v10, %v329_v33 }
  0xe8   :  { %v311_v14 = vsel %vm302_vm0, %v295_v12, inf }
  0xe9   :  { %v312_v39 = vmin.f32 %v308_v13, %v311_v14  ;;  %358 = vmin.xlane.f32.xlu0 %v311_v14  ;;  %370 = vmin.xlane.f32.xlu1 %v328_v8  ;;  %v331_v0 = vrot.slane %v330_v46, 4 }
  0xeb   :  { %v313_v15 = vmin.f32 %v310_v36, %v312_v39  ;;  %v332_v16 = vmin.f32 %v330_v46, %v331_v0 }
  0xed   :  { %v314_v21 = vrot.slane %v313_v15, 4  ;;  %v333_v23 = vrot.slane %v332_v16, 2 }
  0xef   :  { %v315_v43 = vmin.f32 %v313_v15, %v314_v21  ;;  %v334_v11 = vmin.f32 %v332_v16, %v333_v23 }
  0xf1   :  { %v316_v19 = vrot.slane %v315_v43, 2  ;;  %v335_v18 = vrot.slane %v334_v11, 1 }
  0xf3   :  { %v317_v17 = vmin.f32 %v315_v43, %v316_v19  ;;  %v336_v31 = vmin.f32 %v334_v11, %v335_v18 }
  0xf5   :  { %v318_v22 = vrot.slane %v317_v17, 1 }
  0xf7   :  { %v319_v20 = vmin.f32 %v317_v17, %v318_v22 }
  0xf9   :  { %v340_v40 = vsel %vm339_vm1, %v336_v31, %v319_v20 }
  0xfa   :  { %v343_v41 = vsel %vm342_vm2, %v340_v40, 0.0 }
  0xfb   :  { %344 = vadd.xlane.f32.xlu0 %v343_v41 }
 0x140   :  { %v349_v48 = vpop.xlane.xlu1 %348 }
 0x141   :  { %v389_v2 = vrot.slane %v349_v48, %v388_v58 }
 0x144   :  { %v351_v42 = vpop.xlane.xlu0 %350 }
 0x145   :  { %v394_v27 = vrot.slane %v351_v42, %v393_v57 }
 0x147   :  { %v396_v37 = vsel %vm395_vm3, %v394_v27, %v389_v2 }
 0x148   :  { %v361_v34 = vpop.xlane.xlu0 %360  ;;  %v363_v49 = vpop.xlane.xlu1 %362 }
 0x149   :  { %v432_v61 = vrot.slane %v363_v49, %v393_v57  ;;  %v428_v24 = vrot.slane %v361_v34, %v388_v58 }
 0x14b   :  { %v433_v56 = vsel %vm395_vm3, %v432_v61, %v428_v24 }
 0x157   :  { %v353_v51 = vpop.xlane.xlu0 %352 }
 0x158   :  { %v401_v29 = vrot.slane %v353_v51, %v400_v47 }
 0x15a   :  { %v403_v6 = vsel %vm402_vm4, %v401_v29, %v396_v37 }
 0x15b   :  { %v365_v54 = vpop.xlane.xlu1 %364 }
 0x15c   :  { %v437_v63 = vrot.slane %v365_v54, %v400_v47 }
 0x15e   :  { %v438_v7 = vsel %vm402_vm4, %v437_v63, %v433_v56 }
 0x16a   :  { %v355_v52 = vpop.xlane.xlu0 %354 }
 0x16b   :  { %v408_v38 = vrot.slane %v355_v52, %v407_v59 }
 0x16d   :  { %v410_v10 = vsel %vm409_vm5, %v408_v38, %v403_v6 }
 0x16e   :  { %v367_v28 = vpop.xlane.xlu1 %366  ;;  %v357_v62 = vpop.xlane.xlu0 %356 }
 0x16f   :  { %v442_v3 = vrot.slane %v367_v28, %v407_v59  ;;  %v415_v5 = vrot.slane %v357_v62, %v414_v60 }
 0x171   :  { %v443_v33 = vsel %vm409_vm5, %v442_v3, %v438_v7  ;;  %v417_v46 = vsel %vm416_vm6, %v415_v5, %v410_v10 }
 0x172   :  { %v369_v1 = vpop.xlane.xlu1 %368 }
 0x173   :  { %v447_v25 = vrot.slane %v369_v1, %v414_v60 }
 0x175   :  { %v448_v14 = vsel %vm416_vm6, %v447_v25, %v443_v33 }
 0x176   :  { %v371_v8 = vpop.xlane.xlu1 %370  ;;  %v359_v9 = vpop.xlane.xlu0 %358 }
 0x177   :  { %v452_v12 = vrot.slane %v371_v8, %v421_v4  ;;  %v422_v13 = vrot.slane %v359_v9, %v421_v4 }
 0x179   :  { %v424_v36 = vsel %vm423_vm7, %v422_v13, %v417_v46  ;;  %v453_v30 = vsel %vm423_vm7, %v452_v12, %v448_v14 }
 0x17a   :  { %v454_v39 = vsel %vm339_vm1, %v453_v30, %v424_v36 }
 0x17b   :  { %v457_v0 = vsel %vm456_vm8, %v454_v39, 0.0 }
 0x17c   :  { %458 = vadd.xlane.f32.xlu1 %v457_v0 }
 0x188   :  { %v345_v15 = vpop.xlane.xlu0 %344 }
 0x189   :  { %v347_v21 = vmul.f32 0.015625, %v345_v15 }
 0x209   :  { %v459_v16 = vpop.xlane.xlu1 %458 }
 0x20a   :  { %v461_v23 = vmul.f32 0.020833334, %v459_v16 }
 0x20c   :  { %v462_v43 = vadd.f32 %v461_v23, %v347_v21 }
 0x20e   :  { %v463_v11 = vmul.f32 0.5, %v462_v43 }
 0x210   :  { %v468_v19 = vrot.slane %v463_v11, %v622_v35  ;;  %v472_v17 = vrot.slane %v463_v11, %v614_v32 }
 0x212   :  { %475 = vst [vmem:[#allocation2] sm:$0x1] %v468_v19  ;;  %476 = vst [vmem:[#allocation2 + $0x1] sm:$0x1] %v472_v17 }
 0x213   :  { %526 = shalt.err (!%p523_p4)
}
 0x214   :  { %s527_s12 = scalar_lea.hbm %s761_s2, 32 }
 0x215   :  { %p528_p5 = scmp.ne.s32.totalorder %s761_s2, %s527_s12  ;;  %p531_p6 = scmp.lt.u32.totalorder %s527_s12, %s761_s2 }
 0x217   :  { %p533_p7 = pnand %p531_p6, %p528_p5 }
 0x219   :  { %536 = shalt.err (!%p533_p7)
}
 0x21a   :  { %s543_s17 = smov 16   ;;  %s544_s18 = smov 1  }
 0x21b   :  { %488 = dma.vmem_to_hbm [thread:$0]  %s483_s8, 32, %s761_s2, [#allocation3], %s543_s17, %s543_s17, %s544_s18  }
 0x21c   :  { %537 = dma.done.wait [#allocation3], 32  }
 0x21d   :  { %538 = vsyncadd [#allocation3], 4294967264 }
 0x21e   :  { %492 = vsyncpa [#allocation3], 1 }

</bundles_post_ra>
